<compile_context>
chip_gen: v6e
topology: v6e:2x2x1
jax: 0.10.0
libtpu: 0.0.40
codegen_flags: <defaults>
</compile_context>

<pallas_src>
import jax
import jax.numpy as jnp
from jax.experimental import pallas as pl
from jax.experimental.pallas import tpu as pltpu

_EPS = 1e-5


def _pick_block_rows(total, candidates):
    """Largest candidate that divides `total`; else the full extent (always legal)."""
    for c in candidates:
        if total % c == 0:
            return c
    return total


# ---------------------------------------------------------------------------
# Phase 1: 1x1 conv (channel reduction) + ReLU + global sum / sumsq accumulation
# ---------------------------------------------------------------------------
def _conv_relu_stats_kernel(w_ref, x_ref, y_ref, stats_ref):
    # w_ref:     SMEM (C,)          f32   per-channel 1x1 conv weight
    # x_ref:     VMEM (C, TR, 128)  f32   one (batch, spatial-tile) block of x
    # y_ref:     VMEM (TR, 128)     f32   un-normalized ReLU(conv(x)) output block
    # stats_ref: SMEM (2,)          f32   [sum(y), sum(y*y)] accumulated over the grid
    C = x_ref.shape[0]

    # Channel reduction as C unrolled VPU multiply-adds (scalar weight * vector).
    acc = x_ref[0] * w_ref[0]
    for c in range(1, C):
        acc = acc + x_ref[c] * w_ref[c]

    y = jnp.maximum(acc, jnp.float32(0.0))          # ReLU, lane/sublane-dense (TR, 128)
    y_ref[...] = y

    psum = jnp.sum(y)
    psumsq = jnp.sum(y * y)

    first = jnp.logical_and(pl.program_id(0) == 0, pl.program_id(1) == 0)

    @pl.when(first)
    def _():
        stats_ref[0] = jnp.float32(0.0)
        stats_ref[1] = jnp.float32(0.0)

    stats_ref[0] = stats_ref[0] + psum
    stats_ref[1] = stats_ref[1] + psumsq


# ---------------------------------------------------------------------------
# Phase 2: apply batch-norm affine normalization  out = y * scale + shift
# ---------------------------------------------------------------------------
def _normalize_kernel(ss_ref, y_ref, o_ref):
    # ss_ref: SMEM (2,)         f32   [scale, shift]
    # y_ref:  VMEM (TR2, 128)   f32
    # o_ref:  VMEM (TR2, 128)   f32
    o_ref[...] = y_ref[...] * ss_ref[0] + ss_ref[1]


def cvt2d_1c(x, conv_weight, bn_gamma, bn_beta):
    """x: (N, C, H, W) float32 (NCHW, matching PyTorch). Returns (N, 1, H, W)."""
    N, C, H, W = x.shape
    HW = H * W
    M_true = N * HW

    x = x.astype(jnp.float32)
    xf = x.reshape(N, C, HW)                      # free reshape, stays NCHW-contiguous

    # Pad the flattened spatial axis to a multiple of 128 lanes if needed.
    # Padded zeros pass conv/ReLU as zeros, so they contribute nothing to the
    # stats (we divide by the true element count) and are sliced off at the end.
    HW_pad = ((HW + 127) // 128) * 128
    if HW_pad != HW:
        # TODO(synk): this pad is an extra copy; only taken when H*W % 128 != 0.
        xf = jnp.pad(xf, ((0, 0), (0, 0), (0, HW_pad - HW)))
    S = HW_pad // 128
    x4 = xf.reshape(N, C, S, 128)                 # free reshape

    TR = _pick_block_rows(S, (64, 32, 16, 8))     # spatial-tile rows (sublane-dense if possible)
    n_t = S // TR

    w = conv_weight.reshape(C).astype(jnp.float32)

    # -------- Phase 1: conv + ReLU + stats --------
    y_raw, stats = pl.pallas_call(
        _conv_relu_stats_kernel,
        out_shape=(
            jax.ShapeDtypeStruct((N, S, 128), jnp.float32),   # un-normalized y
            jax.ShapeDtypeStruct((2,), jnp.float32),          # [sum, sumsq]
        ),
        grid=(N, n_t),
        in_specs=[
            pl.BlockSpec(memory_space=pltpu.MemorySpace.SMEM),                    # w (C,)
            pl.BlockSpec((pl.Squeezed(), C, TR, 128), lambda n, t: (n, 0, t, 0)), # x block
        ],
        out_specs=(
            pl.BlockSpec((pl.Squeezed(), TR, 128), lambda n, t: (n, t, 0)),       # y block
            pl.BlockSpec(memory_space=pltpu.MemorySpace.SMEM),                    # stats accumulator
        ),
        compiler_params=pltpu.CompilerParams(
            # Sequential grid: the SMEM stats accumulator is carried across iterations.
            dimension_semantics=("arbitrary", "arbitrary"),
        ),
    )(w, x4)

    # -------- Scalar BN math (negligible) --------
    mean = stats[0] / jnp.float32(M_true)
    var = jnp.maximum(stats[1] / jnp.float32(M_true) - mean * mean, 0.0)   # biased var
    inv_std = jax.lax.rsqrt(var + jnp.float32(_EPS))
    gamma = bn_gamma.reshape(()).astype(jnp.float32)
    beta = bn_beta.reshape(()).astype(jnp.float32)
    scale = gamma * inv_std
    shift = beta - mean * scale
    ss = jnp.stack([scale, shift])                # (2,) f32 -> SMEM

    # -------- Phase 2: normalize --------
    R = N * S
    y2 = y_raw.reshape(R, 128)                    # free reshape
    TR2 = _pick_block_rows(R, (256, 128, 64, 32, 16, 8))

    out2 = pl.pallas_call(
        _normalize_kernel,
        out_shape=jax.ShapeDtypeStruct((R, 128), jnp.float32),
        grid=(R // TR2,),
        in_specs=[
            pl.BlockSpec(memory_space=pltpu.MemorySpace.SMEM),       # [scale, shift]
            pl.BlockSpec((TR2, 128), lambda i: (i, 0)),              # y tile
        ],
        out_specs=pl.BlockSpec((TR2, 128), lambda i: (i, 0)),
        input_output_aliases={1: 0},                                 # write in-place over y
        compiler_params=pltpu.CompilerParams(
            dimension_semantics=("parallel",),
        ),
    )(ss, y2)

    # (N*S, 128) -> (N, 1, H, W), dropping any lane padding.
    out = out2.reshape(N, S * 128)[:, :HW].reshape(N, H, W)
    return out[:, None, :, :]


def _reference(x, conv_weight, bn_gamma, bn_beta):
    """Pure-JAX reference of the PyTorch forward (training-mode BN)."""
    conv = jnp.einsum("nchw,c->nhw", x, conv_weight.reshape(-1))[:, None]
    y = jnp.maximum(conv, 0.0)
    mean = jnp.mean(y)
    var = jnp.mean((y - mean) ** 2)
    return bn_gamma.reshape(()) * (y - mean) / jnp.sqrt(var + _EPS) + bn_beta.reshape(())


if __name__ == "__main__":
    key = jax.random.PRNGKey(0)
    k_x, k_w = jax.random.split(key)

    N, C, H, W = 2, 4, 16, 16
    x = jax.random.normal(k_x, (N, C, H, W), dtype=jnp.float32)

    # Deterministic parameter init (shapes from the module's __init__):
    #   Conv2d(in_channels=C, out=1, k=1, bias=False) -> weight (1, C, 1, 1)
    #   BatchNorm2d(1)                                -> gamma (1,), beta (1,)
    bound = 1.0 / jnp.sqrt(jnp.float32(C))
    conv_weight = jax.random.uniform(k_w, (1, C, 1, 1), dtype=jnp.float32,
                                     minval=-bound, maxval=bound)
    bn_gamma = jnp.ones((1,), dtype=jnp.float32)
    bn_beta = jnp.zeros((1,), dtype=jnp.float32)

    out = cvt2d_1c(x, conv_weight, bn_gamma, bn_beta)
    out = jax.block_until_ready(out)

    ref = _reference(x, conv_weight, bn_gamma, bn_beta)
    assert out.shape == (N, 1, H, W), out.shape
    assert jnp.allclose(out, ref, atol=1e-4, rtol=1e-4), float(jnp.max(jnp.abs(out - ref)))

    print("KERNEL_OK")
</pallas_src>

<mosaic_0001>
module attributes {stable_mosaic.version = 11 : i64} {
  func.func @_conv_relu_stats_kernel(%arg0: i32, %arg1: i32, %arg2: memref<4xf32, #tpu.memory_space<smem>>, %arg3: memref<1x4x2x128xf32, #tpu.memory_space<vmem>>, %arg4: memref<1x2x128xf32, #tpu.memory_space<vmem>>, %arg5: memref<2xf32, #tpu.memory_space<smem>>) attributes {dimension_semantics = [#tpu.dimension_semantics<arbitrary>, #tpu.dimension_semantics<arbitrary>], iteration_bounds = array<i64: 2, 1>, scalar_prefetch = 0 : i64, scratch_operands = 0 : i64, tpu.core_type = #tpu.core_type<tc>, window_params = [{transform_indices = @transform_0, window_bounds = array<i64: 4>}, {transform_indices = @transform_1, window_bounds = array<i64: 1, 4, 2, 128>}, {transform_indices = @transform_2, window_bounds = array<i64: 1, 2, 128>}, {transform_indices = @transform_3, window_bounds = array<i64: 2>}]} {
    %c0 = arith.constant 0 : index
    %c0_0 = arith.constant 0 : index
    %c0_1 = arith.constant 0 : index
    %c0_2 = arith.constant 0 : index
    %0 = vector.load %arg3[%c0, %c0_0, %c0_1, %c0_2] : memref<1x4x2x128xf32, #tpu.memory_space<vmem>>, vector<1x1x2x128xf32>
    %1 = vector.shape_cast %0 : vector<1x1x2x128xf32> to vector<2x128xf32>
    %c0_3 = arith.constant 0 : index
    %2 = memref.load %arg2[%c0_3] : memref<4xf32, #tpu.memory_space<smem>>
    %3 = vector.broadcast %2 : f32 to vector<2x128xf32>
    %4 = arith.mulf %1, %3 : vector<2x128xf32>
    %c0_4 = arith.constant 0 : index
    %c1 = arith.constant 1 : index
    %c0_5 = arith.constant 0 : index
    %c0_6 = arith.constant 0 : index
    %5 = vector.load %arg3[%c0_4, %c1, %c0_5, %c0_6] : memref<1x4x2x128xf32, #tpu.memory_space<vmem>>, vector<1x1x2x128xf32>
    %6 = vector.shape_cast %5 : vector<1x1x2x128xf32> to vector<2x128xf32>
    %c1_7 = arith.constant 1 : index
    %7 = memref.load %arg2[%c1_7] : memref<4xf32, #tpu.memory_space<smem>>
    %8 = vector.broadcast %7 : f32 to vector<2x128xf32>
    %9 = arith.mulf %6, %8 : vector<2x128xf32>
    %10 = arith.addf %4, %9 : vector<2x128xf32>
    %c0_8 = arith.constant 0 : index
    %c2 = arith.constant 2 : index
    %c0_9 = arith.constant 0 : index
    %c0_10 = arith.constant 0 : index
    %11 = vector.load %arg3[%c0_8, %c2, %c0_9, %c0_10] : memref<1x4x2x128xf32, #tpu.memory_space<vmem>>, vector<1x1x2x128xf32>
    %12 = vector.shape_cast %11 : vector<1x1x2x128xf32> to vector<2x128xf32>
    %c2_11 = arith.constant 2 : index
    %13 = memref.load %arg2[%c2_11] : memref<4xf32, #tpu.memory_space<smem>>
    %14 = vector.broadcast %13 : f32 to vector<2x128xf32>
    %15 = arith.mulf %12, %14 : vector<2x128xf32>
    %16 = arith.addf %10, %15 : vector<2x128xf32>
    %c0_12 = arith.constant 0 : index
    %c3 = arith.constant 3 : index
    %c0_13 = arith.constant 0 : index
    %c0_14 = arith.constant 0 : index
    %17 = vector.load %arg3[%c0_12, %c3, %c0_13, %c0_14] : memref<1x4x2x128xf32, #tpu.memory_space<vmem>>, vector<1x1x2x128xf32>
    %18 = vector.shape_cast %17 : vector<1x1x2x128xf32> to vector<2x128xf32>
    %c3_15 = arith.constant 3 : index
    %19 = memref.load %arg2[%c3_15] : memref<4xf32, #tpu.memory_space<smem>>
    %20 = vector.broadcast %19 : f32 to vector<2x128xf32>
    %21 = arith.mulf %18, %20 : vector<2x128xf32>
    %22 = arith.addf %16, %21 : vector<2x128xf32>
    %cst = arith.constant 0.000000e+00 : f32
    %23 = vector.broadcast %cst : f32 to vector<2x128xf32>
    %24 = arith.maximumf %22, %23 : vector<2x128xf32>
    %c0_16 = arith.constant 0 : index
    %c0_17 = arith.constant 0 : index
    %c0_18 = arith.constant 0 : index
    %25 = vector.load %arg4[%c0_16, %c0_17, %c0_18] : memref<1x2x128xf32, #tpu.memory_space<vmem>>, vector<1x2x128xf32>
    %26 = vector.shape_cast %25 : vector<1x2x128xf32> to vector<2x128xf32>
    %27 = vector.shape_cast %24 : vector<2x128xf32> to vector<1x2x128xf32>
    tpu.vector_store %arg4[%c0_16, %c0_17, %c0_18], %27 {strides = array<i32>} : memref<1x2x128xf32, #tpu.memory_space<vmem>>, vector<1x2x128xf32>,
    %28 = vector.shape_cast %24 : vector<2x128xf32> to vector<1x2x128xf32>
    %cst_19 = arith.constant dense<0.000000e+00> : vector<1xf32>
    %29 = vector.multi_reduction <add>, %28, %cst_19 [1, 2] : vector<1x2x128xf32> to vector<1xf32>
    %30 = vector.shape_cast %29 : vector<1xf32> to vector<1x1x1xf32>
    %31 = vector.extract %30[0, 0, 0] : f32 from vector<1x1x1xf32>
    %32 = arith.mulf %24, %24 : vector<2x128xf32>
    %33 = vector.shape_cast %32 : vector<2x128xf32> to vector<1x2x128xf32>
    %cst_20 = arith.constant dense<0.000000e+00> : vector<1xf32>
    %34 = vector.multi_reduction <add>, %33, %cst_20 [1, 2] : vector<1x2x128xf32> to vector<1xf32>
    %35 = vector.shape_cast %34 : vector<1xf32> to vector<1x1x1xf32>
    %36 = vector.extract %35[0, 0, 0] : f32 from vector<1x1x1xf32>
    %c0_i32 = arith.constant 0 : i32
    %37 = arith.cmpi eq, %arg0, %c0_i32 : i32
    %c0_i32_21 = arith.constant 0 : i32
    %38 = arith.cmpi eq, %arg1, %c0_i32_21 : i32
    %39 = arith.andi %37, %38 : i1
    %40 = arith.extui %39 : i1 to i32
    %c0_i32_22 = arith.constant 0 : i32
    %41 = arith.cmpi ne, %40, %c0_i32_22 : i32
    scf.if %41 {
      %cst_27 = arith.constant 0.000000e+00 : f32
      %c0_28 = arith.constant 0 : index
      %48 = memref.load %arg5[%c0_28] : memref<2xf32, #tpu.memory_space<smem>>
      memref.store %cst_27, %arg5[%c0_28] : memref<2xf32, #tpu.memory_space<smem>>
      %cst_29 = arith.constant 0.000000e+00 : f32
      %c1_30 = arith.constant 1 : index
      %49 = memref.load %arg5[%c1_30] : memref<2xf32, #tpu.memory_space<smem>>
      memref.store %cst_29, %arg5[%c1_30] : memref<2xf32, #tpu.memory_space<smem>>
    } else {
    }
    %c0_23 = arith.constant 0 : index
    %42 = memref.load %arg5[%c0_23] : memref<2xf32, #tpu.memory_space<smem>>
    %43 = arith.addf %42, %31 : f32
    %c0_24 = arith.constant 0 : index
    %44 = memref.load %arg5[%c0_24] : memref<2xf32, #tpu.memory_space<smem>>
    memref.store %43, %arg5[%c0_24] : memref<2xf32, #tpu.memory_space<smem>>
    %c1_25 = arith.constant 1 : index
    %45 = memref.load %arg5[%c1_25] : memref<2xf32, #tpu.memory_space<smem>>
    %46 = arith.addf %45, %36 : f32
    %c1_26 = arith.constant 1 : index
    %47 = memref.load %arg5[%c1_26] : memref<2xf32, #tpu.memory_space<smem>>
    memref.store %46, %arg5[%c1_26] : memref<2xf32, #tpu.memory_space<smem>>
    return
  }
  func.func @transform_0(%arg0: i32, %arg1: i32) -> i32 {
    %c0_i32 = arith.constant 0 : i32
    %c0_i32_0 = arith.constant 0 : i32
    return %c0_i32 : i32
  }
  func.func @transform_1(%arg0: i32, %arg1: i32) -> (i32, i32, i32, i32) {
    %c0_i32 = arith.constant 0 : i32
    %c0_i32_0 = arith.constant 0 : i32
    %c0_i32_1 = arith.constant 0 : i32
    return %arg0, %c0_i32, %arg1, %c0_i32_0 : i32, i32, i32, i32
  }
  func.func @transform_2(%arg0: i32, %arg1: i32) -> (i32, i32, i32) {
    %c0_i32 = arith.constant 0 : i32
    %c0_i32_0 = arith.constant 0 : i32
    return %arg0, %arg1, %c0_i32 : i32, i32, i32
  }
  func.func @transform_3(%arg0: i32, %arg1: i32) -> i32 {
    %c0_i32 = arith.constant 0 : i32
    %c0_i32_0 = arith.constant 0 : i32
    return %c0_i32 : i32
  }
}

</mosaic_0001>

<bundles_post_ra>
// kernel: tpu_custom_call.1
= control target key start
LH: loop header
LB: loop body
LE: loop exit
PB: predicated region body
PF: predicated region fallthrough
CT: control target
= control target key end

     0   :  { %s861_s0 = inlined_call_operand.hbm [shape: f32[4], index: 0, kind: input, shape index: {}]   ;;  %s862_s1 = inlined_call_operand.hbm [shape: f32[2,4,2,128], index: 1, kind: input, shape index: {}]   ;;  %s863_s2 = inlined_call_operand.hbm [shape: f32[2,2,128], index: 2, kind: output, shape index: {0}]   ;;  %s864_s3 = inlined_call_operand.hbm [shape: f32[2], index: 3, kind: output, shape index: {1}]  }
   0x1   :  { %870 = sst [smem:[#allocation16_spill]] %s861_s0 }
   0x2   :  { %9 = vsyncpa [#allocation5], 0 }
   0x3   :  { %10 = vsyncpa [#allocation3], 0 }
   0x4   :  { %12 = vsyncpa [#allocation3 + $0x1], 0 }
   0x5   :  { %13 = vsyncpa [#allocation4], 0 }
   0x6   :  { %15 = vsyncpa [#allocation4 + $0x1], 0 }
   0x7   :  { %16 = vsyncpa [#allocation6], 0  ;;  %s695_s12 = smov 0   ;;  %s697_s13 = smov 0  }
   0x8   :  { %s699_s14 = smov 0   ;;  %s701_s15 = smov 0  }
   0x9   :  { %s703_s16 = smov 0   ;;  %s705_s17 = smov 0  }
   0xa LB: > { %871 = sst [smem:[#allocation14_spill]] %s666_s17  ;;  %s412_s18 = sadd.s32 4294967295, %s666_s17   ;;  %s666_s17 = sphi %s705_s17, %s891_s17   ;;  %s662_s16 = sphi %s703_s16, %s890_s16   ;;  %s658_s15 = sphi %s701_s15, %s889_s15   ;;  %s654_s14 = sphi %s699_s14, %s888_s14   ;;  %s650_s13 = sphi %s697_s13, %s887_s13   ;;  %s646_s12 = sphi %s695_s12, %s886_s12  }
   0xb   : > { %s413_s19 = sadd.s32 4294967294, %s666_s17   ;;  %s64_s20 = sadd.s32 1, %s654_s14 }
   0xc   : > { %p71_p0 = scmp.ne.s32.totalorder %s654_s14, %s650_s13  ;;  %p72_p1 = scmp.eq.s32.totalorder %s666_s17, 0 }
   0xd   : > { %p77_p2 = scmp.ne.s32.totalorder %s650_s13, %s646_s12  ;;  %p733_p3 = scmp.eq.s32.totalorder %s412_s18, 0 }
   0xe   : > { %p737_p4 = scmp.eq.s32.totalorder %s412_s18, 1  ;;  %p73_p5 = por %p72_p1, %p71_p0 }
   0xf   : > { %p109_p6 = scmp.eq.s32.totalorder %s413_s19, 1  ;;  %p743_p7 = por %p733_p3, %p77_p2 }
  0x10   : > { %s873_s22 = scalar_select %p737_p4, 1, 0 }
  0x11   : > { %p749_p8 = por %p737_p4, %p71_p0  ;;  %p753_p9 = por %p109_p6, %p77_p2 }
  0x12   : > { %p414_p10 = scmp.ge.s32.totalorder %s666_s17, 1  ;;  %p137_p11 = scmp.lt.s32.totalorder %s666_s17, 3 }
  0x13   : > { %s876_s25 = scalar_select %p753_p9, 1, 0 }
  0x14   : > { %p760_p13 = pnand %p414_p10, %p137_p11  ;;  %p471_p1 = scmp.lt.s32.totalorder %s666_s17, 2 }
  0x15   : > { %877 = sst [smem:[#allocation15_spill]] %s876_s25  ;;  %s159_s27 = sand.u32 1, %s654_s14  }
  0x16   : > { %p458_p0 = pneg %p760_p13  ;;  %p768_p2 = pnand %p471_p1, %p73_p5 }
  0x17   : > { %s34_s29 = sadd.s32 1, %s662_s16  ;;  %s417_s30 = sshll.u32 %s159_s27, 3 }
  0x18   : > { %p459_p6 = pnand %p458_p0, %p733_p3  ;;  %p36_p10 = scmp.ge.s32.totalorder %s34_s29, 2 }
  0x19   : > { %s668_s4 = smov [#allocation2]   ;;  %s880_s0 = sld [smem:[#allocation16_spill]] }
  0x1a   : > { %s893_s29 = smov (%p36_p10, %s34_s29), 0  ;;  %s438_s7 = sshll.u32 %s662_s16, 7 }
  0x1b   : > { %s59_s8 = ssub.s32 %s662_s16, %s893_s29  ;;  %s170_s11 = scalar_lea.hbm %s862_s1, %s438_s7 }
  0x1c   : > { %p62_p5 = scmp.eq.s32.totalorder %s59_s8, 0  ;;  %s163_s18 = scalar_lea.vmem [#allocation7], %s417_s30 }
  0x1d   : > { %s171_s19 = sshll.u32 %s163_s18, 4  ;;  %s160_s25 = scalar_lea.sflag [#allocation3], %s159_s27  ;;  %s172_s19 = int_to_ptr.vmem [resolvable:$true] %s171_s19 }
  0x1e   : > { %s789_s17 = scalar_select %p62_p5, %s654_s14, %s64_s20  }
  0x1f   : > { %461 = dma.hbm_to_smem (!%p459_p6), %s880_s0, 16, %s668_s4, [#allocation5]  }
  0x20   : > { %p542_p11 = pneg %p768_p2  ;;  %s553_s4 = scalar_lea.vmem %s172_s19, 128 }
  0x21   : > { %p554_p1 = scmp.ne.s32.totalorder %s172_s19, %s553_s4  ;;  %s669_s5 = smov [#allocation7]  }
  0x22   : > { %s558_s6 = sshll.u32 %s669_s5, 4  ;;  %s559_s6 = int_to_ptr.vmem [resolvable:$false] %s558_s6 }
  0x23   : > { %p556_p0 = pnand %p554_p1, %p542_p11  ;;  %s560_s0 = scalar_lea.vmem %s559_s6, 256 }
  0x24   : > { %p561_p10 = scmp.lt.s32.totalorder %s172_s19, %s559_s6  ;;  %p562_p12 = scmp.lt.s32.totalorder %s560_s0, %s553_s4 }
  0x25   : > { %p557_p6 = pneg %p556_p0 }
  0x26   : > { %p563_p9 = por %p562_p12, %p561_p10 }
  0x28   : > { %p564_p4 = pnand %p563_p9, %p557_p6 }
  0x2a   : > { %567 = shalt.err (!%p564_p4)
}
  0x2b   : > { %s670_s30 = smov 32   ;;  %s671_s20 = smov 2  }
  0x2c   : > { %465 = dma.hbm_to_vmem [thread:$0]  (!%p768_p2), %s170_s11, 128, %s172_s19, %s160_s25, %s670_s30, %s670_s30, %s671_s20  }
  0x2d   : > { %183 = sbr.rel (%p760_p13) target bundleno = 287 (0x11f), region = 28 }
  0x32   : > { %629 = dma.done.wait (%p733_p3), [#allocation5], 16  }
  0x33   : > { %631 = vsyncadd (%p733_p3), [#allocation5], 4294967280  ;;  %s802_s0 = sand.u32 1, %s650_s13  }
  0x34   : > { %s422_s27 = sshll.u32 %s802_s0, 3  ;;  %s190_s7 = scalar_lea.sflag [#allocation3], %s802_s0 }
  0x35   : > { %s193_s8 = scalar_lea.vmem [#allocation7], %s422_s27 }
  0x36   : > { %633 = dma.done.wait (%p743_p7), %s190_s7, 128  }
  0x37   : > { %635 = vsyncadd (%p743_p7), %s190_s7, 4294967168 }
  0x38   : > { %198 = sfence }
  0x39   : > { %s218_s25 = sld [smem:[#allocation2]]  ;;  %v217_v0 = vld [vmem:[%s193_s8] sm:$0x3]  ;;  %v424_v1 = vld [vmem:[%s193_s8 + $0x2] sm:$0x3]  ;;  %vm241_vm0 = vcmask 1041408  }
  0x3a   : > { %s425_s26 = sld [smem:[#allocation2 + $0x1]]  ;;  %v426_v3 = vld [vmem:[%s193_s8 + $0x4] sm:$0x3]  ;;  %v428_v6 = vld [vmem:[%s193_s8 + $0x6] sm:$0x3]  ;;  %p263_p3 = scmp.eq.s32.totalorder %s658_s15, 0 }
  0x3b   : > { %s427_s28 = sld [smem:[#allocation2 + $0x2]]  ;;  %s672_s23 = smov 0.0  }
  0x3c   : > { %s429_s21 = sld [smem:[#allocation2 + $0x3]]  ;;  %s423_s9 = sshll.u32 %s802_s0, 1 }
  0x3d   : > { %450 = sst [smem:[#allocation9]] (%p263_p3), %s672_s23  ;;  %s214_s10 = scalar_lea.vmem [#allocation8], %s423_s9 }
  0x3e   : > { %451 = sst [smem:[#allocation9 + $0x1]] (%p263_p3), %s672_s23  ;;  %s433_s11 = sshll.u32 %s658_s15, 5 }
  0x3f   : > { %v219_v2 = vstv %s218_s25  ;;  %s296_s18 = sshll.u32 %s214_s10, 4  ;;  %s294_s5 = scalar_lea.hbm %s863_s2, %s433_s11  ;;  %s297_s18 = int_to_ptr.vmem [resolvable:$true] %s296_s18 }
  0x40   : > { %v220_v4 = vmul.f32 %v219_v2, %v217_v0  ;;  %v224_v5 = vstv %s425_s26  ;;  %s282_s6 = scalar_lea.sflag [#allocation4], %s802_s0  ;;  %s568_s30 = scalar_lea.vmem %s297_s18, 32 }
  0x41   : > { %v225_v7 = vmul.f32 %v424_v1, %v224_v5  ;;  %v230_v8 = vstv %s427_s28  ;;  %p569_p4 = scmp.ne.s32.totalorder %s297_s18, %s568_s30  ;;  %s673_s20 = smov [#allocation8]  }
  0x42   : > { %v231_v9 = vmul.f32 %v426_v3, %v230_v8  ;;  %v236_v10 = vstv %s429_s21  ;;  %s572_s27 = sshll.u32 %s673_s20, 4  ;;  %s573_s27 = int_to_ptr.vmem [resolvable:$false] %s572_s27 }
  0x43   : > { %v226_v11 = vadd.f32 %v225_v7, %v220_v4  ;;  %v237_v12 = vmul.f32 %v428_v6, %v236_v10  ;;  %p570_p7 = pnand %p569_p4, %p749_p8  ;;  %s574_s7 = scalar_lea.vmem %s573_s27, 64 }
  0x44   : > { %p575_p12 = scmp.lt.s32.totalorder %s297_s18, %s573_s27  ;;  %p576_p13 = scmp.lt.s32.totalorder %s574_s7, %s568_s30 }
  0x45   : > { %v232_v13 = vadd.f32 %v231_v9, %v226_v11  ;;  %p571_p9 = pneg %p570_p7 }
  0x46   : > { %p577_p2 = por %p576_p13, %p575_p12 }
  0x47   : > { %v238_v14 = vadd.f32 %v237_v12, %v232_v13 }
  0x48   : > { %p578_p5 = pnand %p577_p2, %p571_p9 }
  0x49   : > { %v239_v15 = vmax.f32 %v238_v14, 0.0 }
  0x4b   : > { %v242_v16 = vsel %vm241_vm0, %v239_v15, 0.0  ;;  %v252_v17 = vmul.f32 %v239_v15, %v239_v15  ;;  %240 = vst [vmem:[%s214_s10] sm:$0x3] %v239_v15 }
  0x4c   : > { %243 = vadd.xlane.f32.xlu0 %v242_v16 }
  0x4d   : > { %v253_v18 = vsel %vm241_vm0, %v252_v17, 0.0 }
  0x50   : > { %254 = vadd.xlane.f32.xlu0 %v253_v18 }
  0x51   : > { %581 = shalt.err (!%p578_p5)
}
  0x52   : > { %s582_s15 = scalar_lea.hbm %s294_s5, 32  ;;  %s586_s25 = scalar_lea.hbm %s863_s2, 64 }
  0x53   : > { %p583_p11 = scmp.ne.s32.totalorder %s294_s5, %s582_s15  ;;  %p587_p6 = scmp.lt.s32.totalorder %s294_s5, %s863_s2 }
  0x54   : > { %p588_p10 = scmp.lt.s32.totalorder %s586_s25, %s582_s15 }
  0x55   : > { %p584_p1 = pnand %p583_p11, %p749_p8 }
  0x56   : > { %p589_p3 = por %p588_p10, %p587_p6 }
  0x57   : > { %p585_p0 = pneg %p584_p1 }
  0x59   : > { %p590_p4 = pnand %p589_p3, %p585_p0 }
  0x5b   : > { %593 = shalt.err (!%p590_p4)
}
  0x5c   : > { %452 = dma.vmem_to_hbm [thread:$0]  (%p749_p8), %s297_s18, 32, %s294_s5, %s282_s6  }
  0x5d   : > { %s273_s24 = sld [smem:[#allocation9]]  ;;  %s674_s18 = smov [#allocation9]  }
  0x5e   : > { %s431_s21 = sld [smem:[#allocation9 + $0x1]]  ;;  %p881_p8 = scmp.ne.s32.totalorder %s873_s22, 0 }
  0xd5   : > { %v244_v19 = vpop.xlane.xlu0 %243 }
  0xd6   : > { %v245_v20 = vrot.slane %v244_v19, 4 }
  0xd8   : > { %v246_v21 = vadd.f32 %v245_v20, %v244_v19 }
  0xd9   : > { %v255_v22 = vpop.xlane.xlu0 %254 }
  0xda   : > { %v247_v23 = vrot.slane %v246_v21, 2  ;;  %v256_v24 = vrot.slane %v255_v22, 4 }
  0xdc   : > { %v257_v25 = vadd.f32 %v256_v24, %v255_v22  ;;  %v248_v26 = vadd.f32 %v247_v23, %v246_v21 }
  0xde   : > { %v258_v27 = vrot.slane %v257_v25, 2  ;;  %v249_v28 = vrot.slane %v248_v26, 1 }
  0xe0   : > { %v259_v29 = vadd.f32 %v258_v27, %v257_v25  ;;  %v250_v30 = vadd.f32 %v249_v28, %v248_v26 }
  0xe2   : > { %440 = vpush %v250_v30  ;;  %v260_v31 = vrot.slane %v259_v29, 1 }
  0xe4   : > { %v261_v32 = vadd.f32 %v260_v31, %v259_v29 }
  0xe6   : > { %442 = vpush %v261_v32 }
 0x113   : > { %s441_s23 = spop %440 }
 0x114   : > { %s274_s9 = sadd.f32 %s441_s23, %s273_s24 }
 0x116   : > { %276 = sst [smem:[#allocation9]] %s274_s9 }
 0x117   : > { %s443_s10 = spop %442 }
 0x118   : > { %s278_s11 = sadd.f32 %s443_s10, %s431_s21 }
 0x11a   : > { %280 = sst [smem:[#allocation9 + $0x1]] %s278_s11 }
 0x11b   : > { %454 = dma.smem_to_hbm (%p881_p8), %s674_s18, 16, %s864_s3, [#allocation6]  }
 0x11c   : > { %637 = dma.done.wait (%p881_p8), [#allocation6], 16  }
 0x11d   : > { %639 = vsyncadd (%p881_p8), [#allocation6], 4294967280 }
 0x11e   : > { %313 = sfence }
 0x11f PF: > { %s882_s5 = sld [smem:[#allocation15_spill]]  ;;  %s322_s30 = sand.u32 1, %s646_s12  }
 0x120   : > { %s883_s6 = sld [smem:[#allocation14_spill]]  ;;  %s323_s20 = scalar_lea.sflag [#allocation4], %s322_s30 }
 0x125   : > { %p884_p7 = scmp.ne.s32.totalorder %s882_s5, 0 }
 0x126   : > { %p885_p9 = scmp.ge.s32.totalorder %s883_s6, 2 }
 0x128   : > { %p467_p12 = pnand %p885_p9, %p884_p7 }
 0x12a   : > { %p468_p13 = pneg %p467_p12 }
 0x12c   : > { %641 = dma.done.wait (%p468_p13), %s323_s20, 32  }
 0x12d   : > { %643 = vsyncadd (%p468_p13), %s323_s20, 4294967264  ;;  %s22_s27 = sadd.s32 1, %s883_s6   ;;  %s886_s12 = smov %s650_s13 }
 0x12e   : > { %p19_p2 = scmp.ge.s32.totalorder %s22_s27, 4   ;;  %s887_s13 = smov %s654_s14 }
 0x12f   : > { %s888_s14 = smov %s789_s17  ;;  %s889_s15 = smov %s662_s16 }
 0x130   : > { %s890_s16 = smov %s893_s29  ;;  %s891_s17 = smov %s22_s27 }
 0x131   :  { %21 = sbr.rel (!%p19_p2) target bundleno = 10 (0xa), region = 98 }
 0x136   :  { %328 = vsyncpa [#allocation3], 1 }
 0x137   :  { %330 = vsyncpa [#allocation3 + $0x1], 1 }
 0x138   :  { %331 = vsyncpa [#allocation4], 1 }
 0x139   :  { %333 = vsyncpa [#allocation4 + $0x1], 1 }
 0x13a   :  { %334 = vsyncpa [#allocation5], 1 }
 0x13b   :  { %336 = vsyncpa [#allocation5 + $0x1], 1 }
 0x13c   :  { %337 = vsyncpa [#allocation6], 1 }
 0x13d   :  { %339 = vsyncpa [#allocation6 + $0x1], 1 }

</bundles_post_ra>
